<compile_context>
chip_gen: v7x
topology: tpu7x:2x2x1
jax: 0.10.0
libtpu: 0.0.40
codegen_flags: <defaults>
</compile_context>

<pallas_src>
import functools

import jax
import jax.numpy as jnp
from jax.experimental import pallas as pl
from jax.experimental.pallas import tpu as pltpu


def _round_up(x, m):
    return (x + m - 1) // m * m


def _sentiment_kernel(seq_len, ids_ref, comb_ref, bias_ref, mask_ref,
                      fcw_ref, fcb_ref, out_ref):
    M = ids_ref.shape[0]                     # TB * L rows for this batch tile
    L = seq_len
    TB = M // L
    max_fs, Vpad, CB = comb_ref.shape

    ids = ids_ref[...]                       # (M, max_fs) int32, im2col'd token ids
    lane_iota = jax.lax.broadcasted_iota(jnp.int32, (M, Vpad), 1)

    # Conv = one-hot(token) @ (embedding-folded conv weights).  The sum over the
    # kernel-row shift k happens inside these MXU matmuls (f32 accumulation of
    # bf16 operands), so no shift-add / unaligned slicing is needed afterwards.
    y = jnp.zeros((M, CB), jnp.float32)
    for k in range(max_fs):
        onehot = (ids[:, k:k + 1] == lane_iota).astype(jnp.bfloat16)   # (M, Vpad)
        y = y + jnp.dot(onehot, comb_ref[k],
                        preferred_element_type=jnp.float32)            # (M, CB)

    # Lane-dense f32 epilogue across ALL convs at once.
    acc = y.reshape(TB, L, CB)
    acc = jnp.maximum(acc + bias_ref[...][None, :, :], 0.0)   # bias + ReLU (VPU)
    acc = acc * mask_ref[...][None, :, :]                     # zero invalid time steps
    pooled = jnp.max(acc, axis=1)                             # (TB, CB) max over time

    # FC (output_dim=1): VPU multiply + lane reduce; fcb added per row.
    logits = jnp.sum(pooled * fcw_ref[...], axis=-1, keepdims=True) + fcb_ref[...]
    # TODO(synk): Dropout is identity at inference; training-mode masking not implemented.
    out_ref[...] = jnp.broadcast_to(jax.nn.sigmoid(logits), out_ref.shape)


def sentiment_cnn_forward(x_tokens, params, filter_sizes, num_filters,
                          batch_tile=None, rows_target=512):
    """x_tokens: (B, L) int32 token ids.  Returns (B, 1) float32 probabilities."""
    B, L = x_tokens.shape
    table = params["embedding"].astype(jnp.float32)
    V, E = table.shape
    n_convs = len(filter_sizes)
    F = num_filters
    max_fs = max(filter_sizes)
    CB = max(128, _round_up(n_convs * F, 128))     # one lane-dense conv block
    Vpad = max(128, _round_up(V, 128))

    # Fold the embedding table into the conv weights (exact for inference):
    # comb[k][v, i*F+f] = sum_e table[v, e] * conv_i_w[k, e, f]
    # (zero where k >= fs_i or in the lane padding).  f32 fold, bf16 storage.
    # TODO(synk): for large vocab (table too big to fold / hold on-chip) switch
    # to an in-kernel DMA gather of embedding rows instead of the one-hot matmul.
    comb = jnp.zeros((max_fs, Vpad, CB), jnp.float32)
    for i, fs in enumerate(filter_sizes):
        w = params[f"conv{i}_w"].astype(jnp.float32)           # (fs, E, F)
        for k in range(fs):
            comb = comb.at[k, :V, i * F:(i + 1) * F].set(table @ w[k])
    comb = comb.astype(jnp.bfloat16)

    # Lane-packed bias, FC weight row and per-conv valid-time mask (all f32).
    nf = n_convs * F
    bias = jnp.zeros((1, CB), jnp.float32)
    bias = bias.at[0, :nf].set(jnp.concatenate(
        [params[f"conv{i}_b"].reshape(-1) for i in range(n_convs)]).astype(jnp.float32))
    fcw = jnp.zeros((1, CB), jnp.float32)
    fcw = fcw.at[0, :nf].set(params["fc_w"][:, 0].astype(jnp.float32))
    fcb = params["fc_b"].reshape(1, 1).astype(jnp.float32)
    mask = jnp.zeros((L, CB), jnp.float32)
    for i, fs in enumerate(filter_sizes):
        valid = (jnp.arange(L) <= (L - fs)).astype(jnp.float32)        # (L,)
        mask = mask.at[:, i * F:(i + 1) * F].set(jnp.broadcast_to(valid[:, None], (L, F)))

    # Batch tiling: target M = TB*L ~ rows_target rows per grid step, TB a
    # multiple of 8; keep the grid >= 2 steps when the batch allows it so the
    # "parallel" axis can shard across v7x's two TensorCores.
    B_pad8 = _round_up(B, 8)
    TB = _round_up(batch_tile, 8) if batch_tile else _round_up(pl.cdiv(rows_target, L), 8)
    TB = max(8, min(TB, B_pad8))
    if B_pad8 >= 16 and B_pad8 // TB < 2:
        TB = max(8, _round_up(pl.cdiv(B_pad8, 2), 8))
    B_pad = _round_up(B_pad8, TB)
    M = TB * L

    # im2col on the token ids (tiny, int32): row b*L+t, column k holds the token
    # at position t+k (0-padded past the sequence end; those rows are masked).
    x_pad = x_tokens.astype(jnp.int32)
    if B_pad != B:
        x_pad = jnp.pad(x_pad, ((0, B_pad - B), (0, 0)))
    ids = jnp.stack([jnp.pad(x_pad[:, k:], ((0, 0), (0, k))) for k in range(max_fs)],
                    axis=-1).reshape(B_pad * L, max_fs)

    # Explicit scoped-VMEM limit sized from the per-step working set.
    # (Weight blocks are tiny here, so default double-buffering of the constant
    #  blocks is left alone; on v7x with much larger tiles, Buffered(1) on the
    #  constant-index specs would recover a bit more VMEM.)
    step_bytes = (2 * M * max_fs * 4              # ids block (double-buffered)
                  + 2 * max_fs * Vpad * CB * 2    # folded conv weights
                  + 2 * TB * 128 * 4              # output block
                  + (L + 2) * CB * 4 + 4          # bias / mask / fcw / fcb
                  + M * Vpad * 2                  # one-hot temporary
                  + 2 * M * CB * 4 + TB * CB * 4)  # y / acc / pooled temporaries
    vmem_limit = int(min(48 * 2 ** 20, max(24 * 2 ** 20, 4 * step_bytes)))

    kernel = functools.partial(_sentiment_kernel, L)
    flops = 2 * B_pad * L * Vpad * CB * max_fs + 4 * B_pad * L * CB
    bytes_accessed = (ids.size * 4 + comb.size * 2
                      + (bias.size + mask.size + fcw.size + fcb.size) * 4
                      + B_pad * 128 * 4)

    out = pl.pallas_call(
        kernel,
        out_shape=jax.ShapeDtypeStruct((B_pad, 128), jnp.float32),
        grid_spec=pltpu.PrefetchScalarGridSpec(
            num_scalar_prefetch=0,
            grid=(B_pad // TB,),
            in_specs=[
                pl.BlockSpec((M, max_fs), lambda i: (i, 0)),             # token ids (im2col)
                pl.BlockSpec((max_fs, Vpad, CB), lambda i: (0, 0, 0)),   # folded conv W (bf16)
                pl.BlockSpec((1, CB), lambda i: (0, 0)),                 # conv biases
                pl.BlockSpec((L, CB), lambda i: (0, 0)),                 # valid-time mask
                pl.BlockSpec((1, CB), lambda i: (0, 0)),                 # FC weight row
                pl.BlockSpec((1, 1), lambda i: (0, 0)),                  # FC bias
            ],
            out_specs=pl.BlockSpec((TB, 128), lambda i: (i, 0)),         # lane-dense output
        ),
        compiler_params=pltpu.CompilerParams(
            dimension_semantics=("parallel",),
            vmem_limit_bytes=vmem_limit),
        cost_estimate=pl.CostEstimate(
            flops=flops, transcendentals=2 * B_pad, bytes_accessed=bytes_accessed),
    )(ids, comb, bias, mask, fcw, fcb)
    return out[:B, 0:1]


def init_params(key, vocab_size, embed_dim, num_filters, filter_sizes, output_dim=1):
    n_fs = len(filter_sizes)
    keys = jax.random.split(key, 2 * n_fs + 3)
    # Embedding table; padding_idx=1 row is zero (PyTorch zeroes that row at init).
    emb = 0.1 * jax.random.normal(keys[0], (vocab_size, embed_dim), jnp.float32)
    emb = emb.at[1].set(0.0)
    params = {"embedding": emb}
    for i, fs in enumerate(filter_sizes):
        # PyTorch Conv2d weight is (F, 1, fs, E); stored here pre-transposed as (fs, E, F).
        params[f"conv{i}_w"] = 0.1 * jax.random.normal(
            keys[1 + 2 * i], (fs, embed_dim, num_filters), jnp.float32)
        params[f"conv{i}_b"] = 0.1 * jax.random.normal(
            keys[2 + 2 * i], (1, num_filters), jnp.float32)
    in_dim = n_fs * num_filters
    params["fc_w"] = 0.1 * jax.random.normal(keys[-2], (in_dim, output_dim), jnp.float32)
    params["fc_b"] = 0.1 * jax.random.normal(keys[-1], (1, output_dim), jnp.float32)
    return params


def reference_forward(x_tokens, params, filter_sizes):
    """Pure-JAX f32 mirror of the PyTorch forward (eval mode) for a correctness check."""
    emb = jnp.take(params["embedding"], x_tokens, axis=0)        # (B, L, E)
    B, L, E = emb.shape
    pooled = []
    for i, fs in enumerate(filter_sizes):
        w = params[f"conv{i}_w"]                                 # (fs, E, F)
        b = params[f"conv{i}_b"]                                 # (1, F)
        T = L - fs + 1
        acc = jnp.zeros((B, T, w.shape[-1]), jnp.float32)
        for k in range(fs):
            acc = acc + jnp.einsum("bte,ef->btf", emb[:, k:k + T, :], w[k])
        acc = jnp.maximum(acc + b[None, :, :], 0.0)
        pooled.append(jnp.max(acc, axis=1))
    cat = jnp.concatenate(pooled, axis=1)
    logits = cat @ params["fc_w"] + params["fc_b"]
    return jax.nn.sigmoid(logits)


if __name__ == "__main__":
    VOCAB_SIZE, EMBED_DIM, NUM_FILTERS = 50, 32, 8
    FILTER_SIZES = (2, 3, 4)
    B, L = 2, 8

    key = jax.random.PRNGKey(0)
    k_x, k_p = jax.random.split(key)
    x = jax.random.randint(k_x, (B, L), 0, VOCAB_SIZE, dtype=jnp.int32)
    params = init_params(k_p, VOCAB_SIZE, EMBED_DIM, NUM_FILTERS, FILTER_SIZES)

    out = sentiment_cnn_forward(x, params, FILTER_SIZES, NUM_FILTERS)
    out = jax.block_until_ready(out)

    ref = reference_forward(x, params, FILTER_SIZES)
    assert out.shape == (B, 1)
    # bf16 MXU operands (folded embedding x conv weights) -> tolerance loosened
    # vs the pure-f32 reference.
    assert jnp.allclose(out, ref, atol=2e-2), (out, ref)
    print("KERNEL_OK")
</pallas_src>

<mosaic_0001>
module attributes {stable_mosaic.version = 11 : i64} {
  func.func @_sentiment_kernel(%arg0: i32, %arg1: memref<64x4xi32, #tpu.memory_space<vmem>>, %arg2: memref<4x128x128xbf16, #tpu.memory_space<vmem>>, %arg3: memref<1x128xf32, #tpu.memory_space<vmem>>, %arg4: memref<8x128xf32, #tpu.memory_space<vmem>>, %arg5: memref<1x128xf32, #tpu.memory_space<vmem>>, %arg6: memref<1x1xf32, #tpu.memory_space<vmem>>, %arg7: memref<8x128xf32, #tpu.memory_space<vmem>>) attributes {dimension_semantics = [#tpu.dimension_semantics<parallel>], iteration_bounds = array<i64: 1>, scalar_prefetch = 0 : i64, scratch_operands = 0 : i64, tpu.core_type = #tpu.core_type<tc>, window_params = [{transform_indices = @transform_0, window_bounds = array<i64: 64, 4>}, {pipeline_mode = #tpu.pipeline_mode<synchronous>, transform_indices = @transform_1, window_bounds = array<i64: 4, 128, 128>}, {pipeline_mode = #tpu.pipeline_mode<synchronous>, transform_indices = @transform_2, window_bounds = array<i64: 1, 128>}, {pipeline_mode = #tpu.pipeline_mode<synchronous>, transform_indices = @transform_3, window_bounds = array<i64: 8, 128>}, {pipeline_mode = #tpu.pipeline_mode<synchronous>, transform_indices = @transform_4, window_bounds = array<i64: 1, 128>}, {pipeline_mode = #tpu.pipeline_mode<synchronous>, transform_indices = @transform_5, window_bounds = array<i64: 1, 1>}, {transform_indices = @transform_6, window_bounds = array<i64: 8, 128>}]} {
    %c0 = arith.constant 0 : index
    %c0_0 = arith.constant 0 : index
    %0 = vector.load %arg1[%c0, %c0_0] : memref<64x4xi32, #tpu.memory_space<vmem>>, vector<64x4xi32>
    %1 = tpu.iota {dimensions = array<i32: 1>} : vector<64x128xi32>
    %cst = arith.constant 0.000000e+00 : f32
    %2 = vector.broadcast %cst : f32 to vector<64x128xf32>
    %3 = vector.extract_strided_slice %0 {offsets = [0, 0], sizes = [64, 1], strides = [1, 1]} : vector<64x4xi32> to vector<64x1xi32>
    %4 = vector.broadcast %3 : vector<64x1xi32> to vector<64x128xi32>
    %5 = arith.cmpi eq, %4, %1 : vector<64x128xi32>
    %6 = arith.extui %5 : vector<64x128xi1> to vector<64x128xi32>
    %7 = arith.sitofp %6 : vector<64x128xi32> to vector<64x128xf32>
    %8 = arith.truncf %7 : vector<64x128xf32> to vector<64x128xbf16>
    %c0_1 = arith.constant 0 : index
    %c0_2 = arith.constant 0 : index
    %c0_3 = arith.constant 0 : index
    %9 = vector.load %arg2[%c0_1, %c0_2, %c0_3] : memref<4x128x128xbf16, #tpu.memory_space<vmem>>, vector<1x128x128xbf16>
    %10 = vector.shape_cast %9 : vector<1x128x128xbf16> to vector<128x128xbf16>
    %cst_4 = arith.constant dense<0.000000e+00> : vector<64x128xf32>
    %11 = tpu.matmul %8, %10, %cst_4 {dimension_numbers = #tpu.dot_dimension_numbers<[1], [0], [0], [1], [0, 0, 1, 1], [], []>} : vector<64x128xbf16>, vector<128x128xbf16>, vector<64x128xf32> -> vector<64x128xf32>
    %12 = arith.addf %2, %11 : vector<64x128xf32>
    %13 = vector.extract_strided_slice %0 {offsets = [0, 1], sizes = [64, 1], strides = [1, 1]} : vector<64x4xi32> to vector<64x1xi32>
    %14 = vector.broadcast %13 : vector<64x1xi32> to vector<64x128xi32>
    %15 = arith.cmpi eq, %14, %1 : vector<64x128xi32>
    %16 = arith.extui %15 : vector<64x128xi1> to vector<64x128xi32>
    %17 = arith.sitofp %16 : vector<64x128xi32> to vector<64x128xf32>
    %18 = arith.truncf %17 : vector<64x128xf32> to vector<64x128xbf16>
    %c1 = arith.constant 1 : index
    %c0_5 = arith.constant 0 : index
    %c0_6 = arith.constant 0 : index
    %19 = vector.load %arg2[%c1, %c0_5, %c0_6] : memref<4x128x128xbf16, #tpu.memory_space<vmem>>, vector<1x128x128xbf16>
    %20 = vector.shape_cast %19 : vector<1x128x128xbf16> to vector<128x128xbf16>
    %cst_7 = arith.constant dense<0.000000e+00> : vector<64x128xf32>
    %21 = tpu.matmul %18, %20, %cst_7 {dimension_numbers = #tpu.dot_dimension_numbers<[1], [0], [0], [1], [0, 0, 1, 1], [], []>} : vector<64x128xbf16>, vector<128x128xbf16>, vector<64x128xf32> -> vector<64x128xf32>
    %22 = arith.addf %12, %21 : vector<64x128xf32>
    %23 = vector.extract_strided_slice %0 {offsets = [0, 2], sizes = [64, 1], strides = [1, 1]} : vector<64x4xi32> to vector<64x1xi32>
    %24 = vector.broadcast %23 : vector<64x1xi32> to vector<64x128xi32>
    %25 = arith.cmpi eq, %24, %1 : vector<64x128xi32>
    %26 = arith.extui %25 : vector<64x128xi1> to vector<64x128xi32>
    %27 = arith.sitofp %26 : vector<64x128xi32> to vector<64x128xf32>
    %28 = arith.truncf %27 : vector<64x128xf32> to vector<64x128xbf16>
    %c2 = arith.constant 2 : index
    %c0_8 = arith.constant 0 : index
    %c0_9 = arith.constant 0 : index
    %29 = vector.load %arg2[%c2, %c0_8, %c0_9] : memref<4x128x128xbf16, #tpu.memory_space<vmem>>, vector<1x128x128xbf16>
    %30 = vector.shape_cast %29 : vector<1x128x128xbf16> to vector<128x128xbf16>
    %cst_10 = arith.constant dense<0.000000e+00> : vector<64x128xf32>
    %31 = tpu.matmul %28, %30, %cst_10 {dimension_numbers = #tpu.dot_dimension_numbers<[1], [0], [0], [1], [0, 0, 1, 1], [], []>} : vector<64x128xbf16>, vector<128x128xbf16>, vector<64x128xf32> -> vector<64x128xf32>
    %32 = arith.addf %22, %31 : vector<64x128xf32>
    %33 = vector.extract_strided_slice %0 {offsets = [0, 3], sizes = [64, 1], strides = [1, 1]} : vector<64x4xi32> to vector<64x1xi32>
    %34 = vector.broadcast %33 : vector<64x1xi32> to vector<64x128xi32>
    %35 = arith.cmpi eq, %34, %1 : vector<64x128xi32>
    %36 = arith.extui %35 : vector<64x128xi1> to vector<64x128xi32>
    %37 = arith.sitofp %36 : vector<64x128xi32> to vector<64x128xf32>
    %38 = arith.truncf %37 : vector<64x128xf32> to vector<64x128xbf16>
    %c3 = arith.constant 3 : index
    %c0_11 = arith.constant 0 : index
    %c0_12 = arith.constant 0 : index
    %39 = vector.load %arg2[%c3, %c0_11, %c0_12] : memref<4x128x128xbf16, #tpu.memory_space<vmem>>, vector<1x128x128xbf16>
    %40 = vector.shape_cast %39 : vector<1x128x128xbf16> to vector<128x128xbf16>
    %cst_13 = arith.constant dense<0.000000e+00> : vector<64x128xf32>
    %41 = tpu.matmul %38, %40, %cst_13 {dimension_numbers = #tpu.dot_dimension_numbers<[1], [0], [0], [1], [0, 0, 1, 1], [], []>} : vector<64x128xbf16>, vector<128x128xbf16>, vector<64x128xf32> -> vector<64x128xf32>
    %42 = arith.addf %32, %41 : vector<64x128xf32>
    %43 = vector.shape_cast %42 : vector<64x128xf32> to vector<8x8x128xf32>
    %c0_14 = arith.constant 0 : index
    %c0_15 = arith.constant 0 : index
    %44 = vector.load %arg3[%c0_14, %c0_15] : memref<1x128xf32, #tpu.memory_space<vmem>>, vector<1x128xf32>
    %45 = vector.shape_cast %44 : vector<1x128xf32> to vector<1x1x128xf32>
    %46 = vector.broadcast %45 : vector<1x1x128xf32> to vector<8x8x128xf32>
    %47 = arith.addf %43, %46 : vector<8x8x128xf32>
    %cst_16 = arith.constant 0.000000e+00 : f32
    %48 = vector.broadcast %cst_16 : f32 to vector<8x8x128xf32>
    %49 = arith.maximumf %47, %48 : vector<8x8x128xf32>
    %c0_17 = arith.constant 0 : index
    %c0_18 = arith.constant 0 : index
    %50 = vector.load %arg4[%c0_17, %c0_18] : memref<8x128xf32, #tpu.memory_space<vmem>>, vector<8x128xf32>
    %51 = vector.shape_cast %50 : vector<8x128xf32> to vector<1x8x128xf32>
    %52 = vector.broadcast %51 : vector<1x8x128xf32> to vector<8x8x128xf32>
    %53 = arith.mulf %49, %52 : vector<8x8x128xf32>
    %cst_19 = arith.constant dense<0xFF800000> : vector<8x128xf32>
    %54 = vector.multi_reduction <maximumf>, %53, %cst_19 [1] : vector<8x8x128xf32> to vector<8x128xf32>
    %c0_20 = arith.constant 0 : index
    %c0_21 = arith.constant 0 : index
    %55 = vector.load %arg5[%c0_20, %c0_21] : memref<1x128xf32, #tpu.memory_space<vmem>>, vector<1x128xf32>
    %56 = vector.broadcast %55 : vector<1x128xf32> to vector<8x128xf32>
    %57 = arith.mulf %54, %56 : vector<8x128xf32>
    %cst_22 = arith.constant dense<0.000000e+00> : vector<8xf32>
    %58 = vector.multi_reduction <add>, %57, %cst_22 [1] : vector<8x128xf32> to vector<8xf32>
    %59 = vector.shape_cast %58 : vector<8xf32> to vector<8x1xf32>
    %c0_23 = arith.constant 0 : index
    %c0_24 = arith.constant 0 : index
    %60 = vector.load %arg6[%c0_23, %c0_24] : memref<1x1xf32, #tpu.memory_space<vmem>>, vector<1x1xf32>
    %61 = vector.broadcast %60 : vector<1x1xf32> to vector<8x1xf32>
    %62 = arith.addf %59, %61 : vector<8x1xf32>
    %63 = arith.negf %62 : vector<8x1xf32>
    %64 = math.exp %63 : vector<8x1xf32>
    %cst_25 = arith.constant 1.000000e+00 : f32
    %65 = vector.broadcast %cst_25 : f32 to vector<8x1xf32>
    %66 = arith.addf %65, %64 : vector<8x1xf32>
    %67 = arith.divf %65, %66 : vector<8x1xf32>
    %68 = vector.shape_cast %67 : vector<8x1xf32> to vector<8x1xf32>
    %69 = vector.broadcast %68 : vector<8x1xf32> to vector<8x128xf32>
    %c0_26 = arith.constant 0 : index
    %c0_27 = arith.constant 0 : index
    %70 = vector.load %arg7[%c0_26, %c0_27] : memref<8x128xf32, #tpu.memory_space<vmem>>, vector<8x128xf32>
    tpu.vector_store %arg7[%c0_26, %c0_27], %69 {strides = array<i32>} : memref<8x128xf32, #tpu.memory_space<vmem>>, vector<8x128xf32>,
    return
  }
  func.func @transform_0(%arg0: i32) -> (i32, i32) {
    %c0_i32 = arith.constant 0 : i32
    %c0_i32_0 = arith.constant 0 : i32
    return %arg0, %c0_i32 : i32, i32
  }
  func.func @transform_1(%arg0: i32) -> (i32, i32, i32) {
    %c0_i32 = arith.constant 0 : i32
    %c0_i32_0 = arith.constant 0 : i32
    %c0_i32_1 = arith.constant 0 : i32
    %c0_i32_2 = arith.constant 0 : i32
    return %c0_i32, %c0_i32_0, %c0_i32_1 : i32, i32, i32
  }
  func.func @transform_2(%arg0: i32) -> (i32, i32) {
    %c0_i32 = arith.constant 0 : i32
    %c0_i32_0 = arith.constant 0 : i32
    %c0_i32_1 = arith.constant 0 : i32
    return %c0_i32, %c0_i32_0 : i32, i32
  }
  func.func @transform_3(%arg0: i32) -> (i32, i32) {
    %c0_i32 = arith.constant 0 : i32
    %c0_i32_0 = arith.constant 0 : i32
    %c0_i32_1 = arith.constant 0 : i32
    return %c0_i32, %c0_i32_0 : i32, i32
  }
  func.func @transform_4(%arg0: i32) -> (i32, i32) {
    %c0_i32 = arith.constant 0 : i32
    %c0_i32_0 = arith.constant 0 : i32
    %c0_i32_1 = arith.constant 0 : i32
    return %c0_i32, %c0_i32_0 : i32, i32
  }
  func.func @transform_5(%arg0: i32) -> (i32, i32) {
    %c0_i32 = arith.constant 0 : i32
    %c0_i32_0 = arith.constant 0 : i32
    %c0_i32_1 = arith.constant 0 : i32
    return %c0_i32, %c0_i32_0 : i32, i32
  }
  func.func @transform_6(%arg0: i32) -> (i32, i32) {
    %c0_i32 = arith.constant 0 : i32
    %c0_i32_0 = arith.constant 0 : i32
    return %arg0, %c0_i32 : i32, i32
  }
}

</mosaic_0001>

<bundles_post_ra>
// kernel: tpu_custom_call.1
= control target key start
LH: loop header
LB: loop body
LE: loop exit
PB: predicated region body
PF: predicated region fallthrough
CT: control target
= control target key end

     0   :  { %s1581_s0 = inlined_call_operand.vmem [shape: s32[64,4], index: 0, kind: input, shape index: {}]   ;;  %s1582_s1 = inlined_call_operand.hbm [shape: bf16[4,128,128], index: 1, kind: input, shape index: {}]   ;;  %s1583_s2 = inlined_call_operand.vmem [shape: f32[1,128], index: 2, kind: input, shape index: {}]   ;;  %s1584_s3 = inlined_call_operand.vmem [shape: f32[8,128], index: 3, kind: input, shape index: {}]   ;;  %s1585_s4 = inlined_call_operand.vmem [shape: f32[1,128], index: 4, kind: input, shape index: {}]   ;;  %s1586_s5 = inlined_call_operand.<no memory space> [shape: f32[1,1], index: 5, kind: input, shape index: {}]   ;;  %s1587_s6 = inlined_call_operand.hbm [shape: f32[8,128], index: 6, kind: output, shape index: {}]  }
   0x1   :  { %v11_v0 = vstv %s1586_s5 }
   0x2   :  { %12 = vst [vmem:[#allocation2] sm:$0x1] %v11_v0 }
   0x3   :  { %13 = vsyncpa [#allocation4], 0 }
   0x4   :  { %14 = vsyncpa [#allocation5], 0  ;;  %s1338_s23 = smov [#allocation3]   ;;  %s1290_s27 = scalar_lea.hbm %s1582_s1, 4096 }
   0x5   :  { %s22_s24 = sshll.u32 %s1338_s23, 4  ;;  %p1291_p0 = scmp.ne.s32.totalorder %s1582_s1, %s1290_s27  ;;  %s23_s24 = int_to_ptr.vmem [resolvable:$true] %s22_s24 }
   0x6   :  { %p1294_p1 = scmp.lt.u32.totalorder %s1290_s27, %s1582_s1 }
   0x8   :  { %p1296_p2 = pnand %p1294_p1, %p1291_p0 }
   0xa   :  { %1299 = shalt.err (!%p1296_p2)
}
   0xb   :  { %s1300_s5 = scalar_lea.vmem %s23_s24, 4096  ;;  %p1305_p4 = scmp.lt.s32.totalorder %s23_s24, %s23_s24 }
   0xc   :  { %p1301_p3 = scmp.ne.s32.totalorder %s23_s24, %s1300_s5  ;;  %p1306_p5 = scmp.lt.s32.totalorder %s1300_s5, %s1300_s5 }
   0xe   :  { %p1307_p6 = por %p1306_p5, %p1305_p4 }
  0x10   :  { %p1308_p7 = pnand %p1307_p6, %p1301_p3 }
  0x12   :  { %1311 = shalt.err (!%p1308_p7)
}
  0x13   :  { %s1339_s8 = smov 64   ;;  %s1340_s9 = smov 4  }
  0x14   :  { %28 = dma.hbm_to_vmem [thread:$0]  %s1582_s1, 4096, %s23_s24, [#allocation4], %s1339_s8, %s1339_s8, %s1340_s9  }
  0x15   :  { %1334 = dma.done.wait [#allocation4], 4096  }
  0x16   :  { %1335 = vsyncadd [#allocation4], 4294963200  ;;  %v1341_v1 = vmov 2   ;;  %v1342_v2 = vmov 1   ;;  %v1402_v3 = vld [vmem:[%s1581_s0] sm:$0xff]  ;;  %v1409_v4 = vld [vmem:[%s1581_s0 + $0x8] sm:$0xff]  ;;  %v49_v31 = vlaneseq }
  0x17   :  { %1234 = vset.pattern.permute.xlu1 %v1341_v1  ;;  %1233 = vset.pattern.permute.xlu0 %v1342_v2  ;;  %v1254_v5 = vld [vmem:[#allocation3 + $0x40] sm:$0xff]   ;;  %v1255_v6 = vld [vmem:[#allocation3 + $0x48] sm:$0xff]   ;;  %v1421_v8 = vld [vmem:[%s1581_s0 + $0x18] sm:$0xff]  ;;  %v1343_v24 = vmov 3   ;;  %v1344_v29 = vmov 0  }
  0x18   :  { %415 = vperm.xlu1 %1234, %v1402_v3   ;;  %120 = vperm.xlu0 %1233, %v1402_v3   ;;  %v1416_v7 = vld [vmem:[%s1581_s0 + $0x10] sm:$0xff]  ;;  %v1258_v9 = vld [vmem:[#allocation3 + $0x80] sm:$0xff]   ;;  %v1257_v13 = vld [vmem:[#allocation3 + $0x58] sm:$0xff]   ;;  %v1478_v34 = vand.u32 127, %v49_v31  ;;  %v1345_v37 = vmov 1.0|1.0  }
  0x19   :  { %1104 = vmatprep.subr.bf16.mxu1 %v1254_v5  ;;  %v1256_v10 = vld [vmem:[#allocation3 + $0x50] sm:$0xff]   ;;  %v1260_v11 = vld [vmem:[#allocation3 + $0x88] sm:$0xff]   ;;  %1152 = vmatprep.subr.bf16.mxu0 %v1258_v9  ;;  %v1259_v16 = vld [vmem:[#allocation3 + $0x60] sm:$0xff]  }
  0x1a   :  { %1105 = vmatpush3.bf16.msra.mxu1 %v1254_v5  ;;  %v1429_v12 = vld [vmem:[%s1581_s0 + $0x28] sm:$0xff]  ;;  %1153 = vmatpush3.bf16.msra.mxu0 %v1258_v9  ;;  %v1435_v14 = vld [vmem:[%s1581_s0 + $0x30] sm:$0xff]  ;;  %v1443_v17 = vld [vmem:[%s1581_s0 + $0x20] sm:$0xff] }
  0x1b   :  { %1106 = vmatprep.subr.bf16.mxu1 %v1255_v6  ;;  %1154 = vmatprep.subr.bf16.mxu0 %v1260_v11  ;;  %v1262_v15 = vld [vmem:[#allocation3 + $0x90] sm:$0xff]   ;;  %v1261_v18 = vld [vmem:[#allocation3 + $0x68] sm:$0xff]   ;;  %v1264_v19 = vld [vmem:[#allocation3 + $0x98] sm:$0xff]  }
  0x1c   :  { %418 = vperm.xlu1 %1234, %v1409_v4   ;;  %123 = vperm.xlu0 %1233, %v1409_v4   ;;  %v1266_v20 = vld [vmem:[#allocation3 + $0xa0] sm:$0xff]   ;;  %v1263_v21 = vld [vmem:[#allocation3 + $0x70] sm:$0xff]   ;;  %v1267_v22 = vld [vmem:[#allocation3 + $0xa8] sm:$0xff]  }
  0x1d   :  { %v1265_v23 = vld [vmem:[#allocation3 + $0x78] sm:$0xff]   ;;  %v1268_v25 = vld [vmem:[#allocation3 + $0xb0] sm:$0xff]   ;;  %v1457_v27 = vld [vmem:[#allocation3] sm:$0xff]  }
  0x1e   :  { %1107 = vmatpush3.bf16.msra.mxu1 %v1255_v6  ;;  %1155 = vmatpush3.bf16.msra.mxu0 %v1260_v11  ;;  %v48_v26 = vld [vmem:[%s1581_s0 + $0x38] sm:$0xff]  ;;  %v1463_v30 = vld [vmem:[#allocation3 + $0xc0] sm:$0xff]   ;;  %v1271_v40 = vld [vmem:[#allocation3 + $0x8] sm:$0xff]  }
  0x1f   :  { %1108 = vmatprep.subr.bf16.mxu1 %v1256_v10  ;;  %1156 = vmatprep.subr.bf16.mxu0 %v1262_v15  ;;  %v1269_v28 = vld [vmem:[#allocation3 + $0xb8] sm:$0xff]   ;;  %v1273_v43 = vld [vmem:[#allocation3 + $0x10] sm:$0xff]   ;;  %v1274_v48 = vld [vmem:[#allocation3 + $0xc8] sm:$0xff]  }
  0x20   :  { %1235 = vset.pattern.permute.xlu1 %v1342_v2  ;;  %126 = vperm.xlu0 %1233, %v1416_v7   ;;  %v1275_v45 = vld [vmem:[#allocation3 + $0x18] sm:$0xff]   ;;  %v1277_v49 = vld [vmem:[#allocation3 + $0x20] sm:$0xff]   ;;  %v1276_v51 = vld [vmem:[#allocation3 + $0xd0] sm:$0xff]  }
  0x21   :  { %129 = vperm.xlu1 %1235, %v1421_v8   ;;  %v1279_v52 = vld [vmem:[#allocation3 + $0x28] sm:$0xff]   ;;  %v1278_v55 = vld [vmem:[#allocation3 + $0xd8] sm:$0xff]   ;;  %v1281_v56 = vld [vmem:[#allocation3 + $0x30] sm:$0xff]  }
  0x22   :  { %1109 = vmatpush3.bf16.msra.mxu1 %v1256_v10  ;;  %1157 = vmatpush3.bf16.msra.mxu0 %v1262_v15  ;;  %v1280_v59 = vld [vmem:[#allocation3 + $0xe0] sm:$0xff]   ;;  %v1283_v60 = vld [vmem:[#allocation3 + $0x38] sm:$0xff]   ;;  %v1282_v63 = vld [vmem:[#allocation3 + $0xe8] sm:$0xff]  }
  0x23   :  { %1110 = vmatprep.subr.bf16.mxu1 %v1257_v13  ;;  %1158 = vmatprep.subr.bf16.mxu0 %v1264_v19 }
  0x24   :  { %135 = vperm.xlu0 %1233, %v1429_v12  }
  0x25   :  { %1236 = vset.pattern.permute.xlu1 %v1341_v1 }
  0x26   :  { %424 = vperm.xlu1 %1236, %v1421_v8   ;;  %1111 = vmatpush3.bf16.msra.mxu1 %v1257_v13 }
  0x27   :  { %1112 = vmatprep.subr.bf16.mxu1 %v1259_v16  ;;  %1159 = vmatpush3.bf16.msra.mxu0 %v1264_v19 }
  0x28   :  { %138 = vperm.xlu0 %1233, %v1435_v14   ;;  %1160 = vmatprep.subr.bf16.mxu0 %v1266_v20 }
  0x2a   :  { %1237 = vset.pattern.permute.xlu1 %v1342_v2  ;;  %1113 = vmatpush3.bf16.msra.mxu1 %v1259_v16 }
  0x2b   :  { %132 = vperm.xlu1 %1237, %v1443_v17   ;;  %1114 = vmatprep.subr.bf16.mxu1 %v1261_v18 }
  0x2c   :  { %1239 = vset.pattern.permute.xlu0 %v1341_v1  ;;  %1161 = vmatpush3.bf16.msra.mxu0 %v1266_v20 }
  0x2d   :  { %421 = vperm.xlu0 %1239, %v1416_v7   ;;  %1162 = vmatprep.subr.bf16.mxu0 %v1267_v22 }
  0x2e   :  { %1115 = vmatpush3.bf16.msra.mxu1 %v1261_v18 }
  0x2f   :  { %1238 = vset.pattern.permute.xlu1 %v1341_v1  ;;  %1116 = vmatprep.subr.bf16.mxu1 %v1263_v21 }
  0x30   :  { %427 = vperm.xlu1 %1238, %v1443_v17   ;;  %1163 = vmatpush3.bf16.msra.mxu0 %v1267_v22 }
  0x31   :  { %433 = vperm.xlu0 %1239, %v1435_v14   ;;  %1164 = vmatprep.subr.bf16.mxu0 %v1268_v25 }
  0x32   :  { %1117 = vmatpush3.bf16.msra.mxu1 %v1263_v21  ;;  %v1533_v21 = vld [vmem:[%s1583_s2] ss:$0 sm:$0xff] }
  0x33   :  { %1118 = vmatprep.subr.bf16.mxu1 %v1265_v23 }
  0x34   :  { %430 = vperm.xlu1 %1238, %v1429_v12   ;;  %1165 = vmatpush3.bf16.msra.mxu0 %v1268_v25 }
  0x35   :  { %1245 = vset.pattern.permute.xlu0 %v1343_v24  ;;  %1166 = vmatprep.subr.bf16.mxu0 %v1269_v28 }
  0x36   :  { %611 = vperm.xlu0 %1245, %v1416_v7   ;;  %1119 = vmatpush3.bf16.msra.mxu1 %v1265_v23 }
  0x37   :  { %1128 = vmatprep.subr.bf16.mxu1 %v1457_v27 }
  0x38   :  { %1240 = vset.pattern.permute.xlu1 %v1342_v2  ;;  %1167 = vmatpush3.bf16.msra.mxu0 %v1269_v28  ;;  %v1285_v2 = vld [vmem:[#allocation3 + $0xf8] sm:$0xff]  }
  0x39   :  { %141 = vperm.xlu1 %1240, %v48_v26   ;;  %1176 = vmatprep.subr.bf16.mxu0 %v1463_v30 }
  0x3a   :  { %1246 = vset.pattern.permute.xlu0 %v1344_v29 }
  0x3b   :  { %55 = vperm.xlu0 %1246, %v1409_v4  }
  0x3d   :  { %1241 = vset.pattern.permute.xlu1 %v1341_v1  ;;  %v1284_v1 = vld [vmem:[#allocation3 + $0xf0] sm:$0xff]  }
  0x3e   :  { %436 = vperm.xlu1 %1241, %v48_v26  }
  0x3f   :  { %58 = vperm.xlu0 %1246, %v1416_v7  }
  0x42   :  { %1242 = vset.pattern.permute.xlu1 %v1344_v29 }
  0x43   :  { %52 = vperm.xlu1 %1242, %v1402_v3   ;;  %67 = vperm.xlu0 %1246, %v1429_v12  }
  0x47   :  { %1243 = vset.pattern.permute.xlu1 %v1343_v24  ;;  %70 = vperm.xlu0 %1246, %v1435_v14  }
  0x48   :  { %605 = vperm.xlu1 %1243, %v1402_v3  }
  0x4b   :  { %1251 = vset.pattern.permute.xlu0 %v1343_v24 }
  0x4c   :  { %608 = vperm.xlu1 %1243, %v1409_v4   ;;  %623 = vperm.xlu0 %1251, %v1435_v14  }
  0x50   :  { %1244 = vset.pattern.permute.xlu1 %v1344_v29  ;;  %1253 = vset.pattern.permute.xlu0 %v1344_v29 }
  0x51   :  { %61 = vperm.xlu1 %1244, %v1421_v8  }
  0x55   :  { %1247 = vset.pattern.permute.xlu1 %v1343_v24 }
  0x56   :  { %614 = vperm.xlu1 %1247, %v1421_v8  }
  0x5a   :  { %1248 = vset.pattern.permute.xlu1 %v1344_v29 }
  0x5b   :  { %64 = vperm.xlu1 %1248, %v1443_v17  }
  0x5f   :  { %1249 = vset.pattern.permute.xlu1 %v1343_v24 }
  0x60   :  { %617 = vperm.xlu1 %1249, %v1443_v17  }
  0x64   :  { %620 = vperm.xlu1 %1249, %v1429_v12  }
  0x68   :  { %1250 = vset.pattern.permute.xlu1 %v1344_v29  ;;  %v1539_v29 = vld [vmem:[%s1584_s3] sm:$0xff] }
  0x69   :  { %73 = vperm.xlu1 %1250, %v48_v26  }
  0x6d   :  { %1252 = vset.pattern.permute.xlu1 %v1343_v24 }
  0x6e   :  { %626 = vperm.xlu1 %1252, %v48_v26  }
  0x97   :  { %v416_v32 = vpop.permute.xlu1 %415  ;;  %v121_v33 = vpop.permute.xlu0 %120 }
  0x98   :  { %vm143_vm0 = vcmp.eq.s32.totalorder %v121_v33, %v1478_v34  ;;  %vm438_vm1 = vcmp.eq.s32.totalorder %v416_v32, %v1478_v34 }
  0x9b   :  { %v419_v35 = vpop.permute.xlu1 %418  ;;  %v124_v36 = vpop.permute.xlu0 %123 }
  0x9c   :  { %vm439_vm2 = vcmp.eq.s32.totalorder %v419_v35, %v1478_v34  ;;  %vm144_vm3 = vcmp.eq.s32.totalorder %v124_v36, %v1478_v34 }
  0x9d   :  { %vm1020_vm4 = vmpackc.low %vm439_vm2, %vm438_vm1 }
  0x9e   :  { %1168 = vmatprep.mubr.msk.bf16.mxu0 %vm1020_vm4, %v1345_v37  ;;  %vm980_vm5 = vmpackc.low %vm144_vm3, %vm143_vm0 }
  0x9f   :  { %v127_v38 = vpop.permute.xlu0 %126  ;;  %1120 = vmatprep.mubr.msk.bf16.mxu1 %vm980_vm5, %v1345_v37 }
  0xa0   :  { %v130_v39 = vpop.permute.xlu1 %129  ;;  %vm145_vm6 = vcmp.eq.s32.totalorder %v127_v38, %v1478_v34 }
  0xa1   :  { %vm146_vm7 = vcmp.eq.s32.totalorder %v130_v39, %v1478_v34 }
  0xa2   :  { %vm982_vm8 = vmpackc.low %vm146_vm7, %vm145_vm6 }
  0xa3   :  { %1121 = vmatmul.mubr.msk.bf16.vlgmr.msra.gmra.mrb[0].mxu1 %vm982_vm8, %v1345_v37  ;;  %v136_v41 = vpop.permute.xlu0 %135 }
  0xa4   :  { %1129 = vmatpush3.bf16.msra.mxu1 %v1457_v27  ;;  %vm148_vm9 = vcmp.eq.s32.totalorder %v136_v41, %v1478_v34 }
  0xa5   :  { %v425_v42 = vpop.permute.xlu1 %424  ;;  %1130 = vmatprep.subr.bf16.mxu1 %v1271_v40 }
  0xa6   :  { %vm441_vm12 = vcmp.eq.s32.totalorder %v425_v42, %v1478_v34 }
  0xa7   :  { %v139_v44 = vpop.permute.xlu0 %138 }
  0xa8   :  { %1131 = vmatpush3.bf16.msra.mxu1 %v1271_v40  ;;  %vm149_vm2 = vcmp.eq.s32.totalorder %v139_v44, %v1478_v34 }
  0xa9   :  { %1132 = vmatprep.subr.bf16.mxu1 %v1273_v43 }
  0xaa   :  { %v133_v46 = vpop.permute.xlu1 %132 }
  0xab   :  { %vm147_vm10 = vcmp.eq.s32.totalorder %v133_v46, %v1478_v34 }
  0xac   :  { %vm984_vm11 = vmpackc.low %vm148_vm9, %vm147_vm10  ;;  %v422_v47 = vpop.permute.xlu0 %421  ;;  %1133 = vmatpush3.bf16.msra.mxu1 %v1273_v43 }
  0xad   :  { %vm440_vm13 = vcmp.eq.s32.totalorder %v422_v47, %v1478_v34  ;;  %1124 = vmatprep.mubr.msk.bf16.mxu1 %vm984_vm11, %v1345_v37  ;;  %1134 = vmatprep.subr.bf16.mxu1 %v1275_v45 }
  0xae   :  { %vm1022_vm14 = vmpackc.low %vm441_vm12, %vm440_vm13 }
  0xaf   :  { %v428_v50 = vpop.permute.xlu1 %427  ;;  %1169 = vmatmul.mubr.msk.bf16.vlgmr.msra.gmra.mrb[0].mxu0 %vm1022_vm14, %v1345_v37 }
  0xb0   :  { %1177 = vmatpush3.bf16.msra.mxu0 %v1463_v30  ;;  %1135 = vmatpush3.bf16.msra.mxu1 %v1275_v45  ;;  %v434_v53 = vpop.permute.xlu0 %433  ;;  %vm442_vm15 = vcmp.eq.s32.totalorder %v428_v50, %v1478_v34 }
  0xb1   :  { %1178 = vmatprep.subr.bf16.mxu0 %v1274_v48  ;;  %1136 = vmatprep.subr.bf16.mxu1 %v1277_v49  ;;  %vm444_vm5 = vcmp.eq.s32.totalorder %v434_v53, %v1478_v34 }
  0xb3   :  { %v431_v54 = vpop.permute.xlu1 %430 }
  0xb4   :  { %vm443_vm0 = vcmp.eq.s32.totalorder %v431_v54, %v1478_v34  ;;  %1179 = vmatpush3.bf16.msra.mxu0 %v1274_v48  ;;  %1137 = vmatpush3.bf16.msra.mxu1 %v1277_v49 }
  0xb5   :  { %vm1024_vm1 = vmpackc.low %vm443_vm0, %vm442_vm15  ;;  %1180 = vmatprep.subr.bf16.mxu0 %v1276_v51  ;;  %1138 = vmatprep.subr.bf16.mxu1 %v1279_v52  ;;  %v612_v58 = vpop.permute.xlu0 %611 }
  0xb6   :  { %1172 = vmatprep.mubr.msk.bf16.mxu0 %vm1024_vm1, %v1345_v37  ;;  %vm630_vm1 = vcmp.eq.s32.totalorder %v612_v58, %v1478_v34 }
  0xb8   :  { %v142_v57 = vpop.permute.xlu1 %141  ;;  %1181 = vmatpush3.bf16.msra.mxu0 %v1276_v51  ;;  %1139 = vmatpush3.bf16.msra.mxu1 %v1279_v52 }
  0xb9   :  { %vm150_vm3 = vcmp.eq.s32.totalorder %v142_v57, %v1478_v34  ;;  %1182 = vmatprep.subr.bf16.mxu0 %v1278_v55  ;;  %1140 = vmatprep.subr.bf16.mxu1 %v1281_v56 }
  0xba   :  { %vm986_vm4 = vmpackc.low %vm150_vm3, %vm149_vm2  ;;  %v56_v62 = vpop.permute.xlu0 %55 }
  0xbb   :  { %1125 = vmatmul.mubr.msk.bf16.gmra.mrb[4].mxu1 %vm986_vm4, %v1345_v37  ;;  %vm76_vm8 = vcmp.eq.s32.totalorder %v56_v62, %v1478_v34 }
  0xbc   :  { %1183 = vmatpush3.bf16.msra.mxu0 %v1278_v55  ;;  %1141 = vmatpush3.bf16.msra.mxu1 %v1281_v56 }
  0xbd   :  { %v437_v61 = vpop.permute.xlu1 %436  ;;  %1184 = vmatprep.subr.bf16.mxu0 %v1280_v59  ;;  %1142 = vmatprep.subr.bf16.mxu1 %v1283_v60 }
  0xbe   :  { %vm445_vm6 = vcmp.eq.s32.totalorder %v437_v61, %v1478_v34  ;;  %v59_v5 = vpop.permute.xlu0 %58 }
  0xbf   :  { %vm1026_vm7 = vmpackc.low %vm445_vm6, %vm444_vm5  ;;  %vm77_vm14 = vcmp.eq.s32.totalorder %v59_v5, %v1478_v34 }
  0xc0   :  { %1173 = vmatmul.mubr.msk.bf16.gmra.mrb[4].mxu0 %vm1026_vm7, %v1345_v37  ;;  %1143 = vmatpush3.bf16.msra.mxu1 %v1283_v60 }
  0xc1   :  { %1185 = vmatpush3.bf16.msra.mxu0 %v1280_v59 }
  0xc2   :  { %v53_v0 = vpop.permute.xlu1 %52  ;;  %1186 = vmatprep.subr.bf16.mxu0 %v1282_v63  ;;  %v68_v8 = vpop.permute.xlu0 %67 }
  0xc3   :  { %vm75_vm9 = vcmp.eq.s32.totalorder %v53_v0, %v1478_v34  ;;  %vm80_vm4 = vcmp.eq.s32.totalorder %v68_v8, %v1478_v34 }
  0xc4   :  { %vm996_vm10 = vmpackc.low %vm76_vm8, %vm75_vm9 }
  0xc5   :  { %1144 = vmatprep.mubr.msk.bf16.mxu1 %vm996_vm10, %v1345_v37  ;;  %1187 = vmatpush3.bf16.msra.mxu0 %v1282_v63  ;;  %v1551_v63 = vld [vmem:[%s1585_s4] ss:$0 sm:$0xff]  ;;  %s1346_s4 = smov [#allocation6]  }
  0xc6   :  { %1188 = vmatprep.subr.bf16.mxu0 %v1284_v1  ;;  %v71_v12 = vpop.permute.xlu0 %70  ;;  %s947_s30 = sshll.u32 %s1346_s4, 4  ;;  %s948_s30 = int_to_ptr.vmem [resolvable:$true] %s947_s30 }
  0xc7   :  { %v606_v3 = vpop.permute.xlu1 %605  ;;  %vm81_vm10 = vcmp.eq.s32.totalorder %v71_v12, %v1478_v34  ;;  %s1312_s7 = scalar_lea.vmem %s948_s30, 128  ;;  %p1317_p9 = scmp.lt.s32.totalorder %s948_s30, %s948_s30 }
  0xc8   :  { %vm628_vm11 = vcmp.eq.s32.totalorder %v606_v3, %v1478_v34  ;;  %p1313_p8 = scmp.ne.s32.totalorder %s948_s30, %s1312_s7  ;;  %p1318_p10 = scmp.lt.s32.totalorder %s1312_s7, %s1312_s7 }
  0xc9   :  { %1189 = vmatpush3.bf16.msra.mxu0 %v1284_v1 }
  0xca   :  { %1190 = vmatprep.subr.bf16.mxu0 %v1285_v2  ;;  %p1319_p11 = por %p1318_p10, %p1317_p9 }
  0xcb   :  { %v609_v4 = vpop.permute.xlu1 %608  ;;  %v624_v14 = vpop.permute.xlu0 %623 }
  0xcc   :  { %vm629_vm12 = vcmp.eq.s32.totalorder %v609_v4, %v1478_v34  ;;  %p1320_p12 = pnand %p1319_p11, %p1313_p8 }
  0xcd   :  { %vm1044_vm13 = vmpackc.low %vm629_vm12, %vm628_vm11  ;;  %1191 = vmatpush3.bf16.msra.mxu0 %v1285_v2 }
  0xce   :  { %1192 = vmatprep.mubr.msk.bf16.mxu0 %vm1044_vm13, %v1345_v37  ;;  %vm634_vm13 = vcmp.eq.s32.totalorder %v624_v14, %v1478_v34 }
  0xd0   :  { %v62_v6 = vpop.permute.xlu1 %61 }
  0xd1   :  { %vm78_vm15 = vcmp.eq.s32.totalorder %v62_v6, %v1478_v34 }
  0xd2   :  { %vm998_vm0 = vmpackc.low %vm78_vm15, %vm77_vm14 }
  0xd3   :  { %1145 = vmatmul.mubr.msk.bf16.vlgmr.msra.gmra.mrb[0].mxu1 %vm998_vm0, %v1345_v37  ;;  %vm898_vm0 = vcmask 1041409  }
  0xd5   :  { %v615_v7 = vpop.permute.xlu1 %614 }
  0xd6   :  { %vm631_vm2 = vcmp.eq.s32.totalorder %v615_v7, %v1478_v34 }
  0xd7   :  { %vm1046_vm3 = vmpackc.low %vm631_vm2, %vm630_vm1  ;;  %vm901_vm1 = vcmask 1042434   ;;  %vm904_vm2 = vcmask 1043459  }
  0xd8   :  { %1193 = vmatmul.mubr.msk.bf16.vlgmr.msra.gmra.mrb[0].mxu0 %vm1046_vm3, %v1345_v37  ;;  %vm907_vm3 = vcmask 1044484  }
  0xda   :  { %v65_v9 = vpop.permute.xlu1 %64 }
  0xdb   :  { %vm79_vm5 = vcmp.eq.s32.totalorder %v65_v9, %v1478_v34 }
  0xdc   :  { %vm1000_vm6 = vmpackc.low %vm80_vm4, %vm79_vm5  ;;  %vm910_vm4 = vcmask 1045509   ;;  %vm913_vm5 = vcmask 1046534  }
  0xdd   :  { %1148 = vmatprep.mubr.msk.bf16.mxu1 %vm1000_vm6, %v1345_v37  ;;  %vm916_vm6 = vcmask 1047559  }
  0xdf   :  { %v618_v10 = vpop.permute.xlu1 %617 }
  0xe0   :  { %vm632_vm7 = vcmp.eq.s32.totalorder %v618_v10, %v1478_v34 }
  0xe3   :  { %v621_v11 = vpop.permute.xlu1 %620 }
  0xe4   :  { %vm633_vm8 = vcmp.eq.s32.totalorder %v621_v11, %v1478_v34 }
  0xe5   :  { %vm1048_vm9 = vmpackc.low %vm633_vm8, %vm632_vm7 }
  0xe6   :  { %1196 = vmatprep.mubr.msk.bf16.mxu0 %vm1048_vm9, %v1345_v37 }
  0xe8   :  { %v74_v13 = vpop.permute.xlu1 %73 }
  0xe9   :  { %vm82_vm11 = vcmp.eq.s32.totalorder %v74_v13, %v1478_v34 }
  0xea   :  { %vm1002_vm12 = vmpackc.low %vm82_vm11, %vm81_vm10 }
  0xeb   :  { %1149 = vmatmul.mubr.msk.bf16.gmra.mrb[4].mxu1 %vm1002_vm12, %v1345_v37 }
  0xed   :  { %v627_v15 = vpop.permute.xlu1 %626 }
  0xee   :  { %vm635_vm14 = vcmp.eq.s32.totalorder %v627_v15, %v1478_v34 }
  0xef   :  { %vm1050_vm15 = vmpackc.low %vm635_vm14, %vm634_vm13 }
  0xf0   :  { %1197 = vmatmul.mubr.msk.bf16.gmra.mrb[4].mxu0 %vm1050_vm15, %v1345_v37 }
 0x1a6   :  { %v1146_v16 = vpop.f32.mrb[0].mxu1 }
 0x1a7   :  { %v383_v17 = vpop.f32.mrb[1].mxu1 }
 0x1a8   :  { %v1147_v18 = vpop.f32.mrb[2].mxu1 }
 0x1a9   :  { %v386_v19 = vpop.f32.mrb[3].mxu1 }
 0x1ab   :  { %v1194_v20 = vpop.f32.mrb[0].mxu0 }
 0x1ac   :  { %v1200_v22 = vadd.f32 %v1194_v20, %v1146_v16  ;;  %v755_v23 = vpop.f32.mrb[1].mxu0 }
 0x1ad   :  { %v1201_v24 = vadd.f32 %v755_v23, %v383_v17  ;;  %v1195_v25 = vpop.f32.mrb[2].mxu0 }
 0x1ae   :  { %v803_v26 = vadd.f32 %v1200_v22, %v1533_v21  ;;  %v1202_v27 = vadd.f32 %v1195_v25, %v1147_v18  ;;  %v758_v28 = vpop.f32.mrb[3].mxu0 }
 0x1af   :  { %v801_v30 = vadd.f32 %v1201_v24, %v1533_v21  ;;  %v1203_v31 = vadd.f32 %v758_v28, %v386_v19 }
 0x1b0   :  { %v811_v32 = vmax.f32 %v803_v26, 0.0  ;;  %v804_v33 = vadd.f32 %v1202_v27, %v1533_v21 }
 0x1b1   :  { %v809_v34 = vmax.f32 %v801_v30, 0.0  ;;  %v802_v35 = vadd.f32 %v1203_v31, %v1533_v21 }
 0x1b2   :  { %v820_v36 = vmul.f32 %v1539_v29, %v811_v32  ;;  %v812_v37 = vmax.f32 %v804_v33, 0.0 }
 0x1b3   :  { %v818_v38 = vmul.f32 %v1539_v29, %v809_v34  ;;  %v810_v39 = vmax.f32 %v802_v35, 0.0 }
 0x1b4   :  { %v838_v40 = vrot.slane %v820_v36, 4  ;;  %v821_v41 = vmul.f32 %v1539_v29, %v812_v37 }
 0x1b5   :  { %v826_v42 = vrot.slane %v818_v38, 4  ;;  %v819_v43 = vmul.f32 %v1539_v29, %v810_v39 }
 0x1b6   :  { %v839_v44 = vmax.f32 %v820_v36, %v838_v40  ;;  %v844_v45 = vrot.slane %v821_v41, 4 }
 0x1b7   :  { %v827_v46 = vmax.f32 %v818_v38, %v826_v42  ;;  %v832_v47 = vrot.slane %v819_v43, 4 }
 0x1b8   :  { %v840_v48 = vrot.slane %v839_v44, 2  ;;  %v845_v49 = vmax.f32 %v821_v41, %v844_v45 }
 0x1b9   :  { %v828_v50 = vrot.slane %v827_v46, 2  ;;  %v833_v51 = vmax.f32 %v819_v43, %v832_v47 }
 0x1ba   :  { %v841_v52 = vmax.f32 %v839_v44, %v840_v48  ;;  %v846_v53 = vrot.slane %v845_v49, 2 }
 0x1bb   :  { %v829_v54 = vmax.f32 %v827_v46, %v828_v50  ;;  %v834_v55 = vrot.slane %v833_v51, 2 }
 0x1bc   :  { %v842_v56 = vrot.slane %v841_v52, 1  ;;  %v847_v57 = vmax.f32 %v845_v49, %v846_v53 }
 0x1bd   :  { %v830_v58 = vrot.slane %v829_v54, 1  ;;  %v835_v59 = vmax.f32 %v833_v51, %v834_v55 }
 0x1be   :  { %v843_v60 = vmax.f32 %v841_v52, %v842_v56  ;;  %v848_v61 = vrot.slane %v847_v57, 1  ;;  %v1150_v62 = vpop.f32.mrb[4].mxu1 }
 0x1bf   :  { %v836_v0 = vrot.slane %v835_v59, 1  ;;  %v399_v1 = vpop.f32.mrb[5].mxu1  ;;  %v831_v4 = vmax.f32 %v829_v54, %v830_v58 }
 0x1c0   :  { %v849_v2 = vmax.f32 %v847_v57, %v848_v61  ;;  %v1151_v3 = vpop.f32.mrb[6].mxu1  ;;  %v883_v7 = vmul.f32 %v1551_v63, %v843_v60 }
 0x1c1   :  { %v837_v5 = vmax.f32 %v835_v59, %v836_v0  ;;  %v402_v6 = vpop.f32.mrb[7].mxu1  ;;  %v881_v13 = vmul.f32 %v1551_v63, %v831_v4 }
 0x1c2   :  { %v884_v8 = vmul.f32 %v1551_v63, %v849_v2  ;;  %v900_v17 = vrot.slane %v883_v7, 6 }
 0x1c3   :  { %v882_v9 = vmul.f32 %v1551_v63, %v837_v5  ;;  %v1198_v10 = vpop.f32.mrb[4].mxu0 }
 0x1c4   :  { %v1204_v11 = vadd.f32 %v1198_v10, %v1150_v62  ;;  %v771_v12 = vpop.f32.mrb[5].mxu0  ;;  %v903_v22 = vrot.slane %v884_v8, 5  ;;  %v1054_v10 = vld [vmem:[#allocation2] ss:$0 sm:$0xff] }
 0x1c5   :  { %v897_v14 = vrot.slane %v882_v9, 7  ;;  %v1205_v15 = vadd.f32 %v771_v12, %v399_v1  ;;  %v1199_v16 = vpop.f32.mrb[6].mxu0 }
 0x1c6   :  { %v807_v18 = vadd.f32 %v1204_v11, %v1533_v21  ;;  %v1206_v19 = vadd.f32 %v1199_v16, %v1151_v3  ;;  %v774_v20 = vpop.f32.mrb[7].mxu0 }
 0x1c7   :  { %v805_v23 = vadd.f32 %v1205_v15, %v1533_v21  ;;  %v1207_v24 = vadd.f32 %v774_v20, %v402_v6  ;;  %v899_v25 = vsel %vm898_vm0, %v897_v14, %v881_v13 }
 0x1c8   :  { %v815_v26 = vmax.f32 %v807_v18, 0.0  ;;  %v808_v27 = vadd.f32 %v1206_v19, %v1533_v21  ;;  %v902_v28 = vsel %vm901_vm1, %v900_v17, %v899_v25 }
 0x1c9   :  { %v813_v30 = vmax.f32 %v805_v23, 0.0  ;;  %v806_v31 = vadd.f32 %v1207_v24, %v1533_v21  ;;  %v905_v32 = vsel %vm904_vm2, %v903_v22, %v902_v28 }
 0x1ca   :  { %v824_v33 = vmul.f32 %v1539_v29, %v815_v26  ;;  %v816_v34 = vmax.f32 %v808_v27, 0.0 }
 0x1cb   :  { %v822_v35 = vmul.f32 %v1539_v29, %v813_v30  ;;  %v814_v36 = vmax.f32 %v806_v31, 0.0 }
 0x1cc   :  { %v862_v37 = vrot.slane %v824_v33, 4  ;;  %v825_v38 = vmul.f32 %v1539_v29, %v816_v34 }
 0x1cd   :  { %v850_v39 = vrot.slane %v822_v35, 4  ;;  %v823_v40 = vmul.f32 %v1539_v29, %v814_v36 }
 0x1ce   :  { %v863_v41 = vmax.f32 %v824_v33, %v862_v37  ;;  %v868_v42 = vrot.slane %v825_v38, 4 }
 0x1cf   :  { %v851_v43 = vmax.f32 %v822_v35, %v850_v39  ;;  %v856_v44 = vrot.slane %v823_v40, 4 }
 0x1d0   :  { %v864_v45 = vrot.slane %v863_v41, 2  ;;  %v869_v46 = vmax.f32 %v825_v38, %v868_v42 }
 0x1d1   :  { %v852_v21 = vrot.slane %v851_v43, 2  ;;  %v857_v47 = vmax.f32 %v823_v40, %v856_v44 }
 0x1d2   :  { %v865_v48 = vmax.f32 %v863_v41, %v864_v45  ;;  %v870_v49 = vrot.slane %v869_v46, 2 }
 0x1d3   :  { %v853_v50 = vmax.f32 %v851_v43, %v852_v21  ;;  %v858_v51 = vrot.slane %v857_v47, 2 }
 0x1d4   :  { %v866_v52 = vrot.slane %v865_v48, 1  ;;  %v871_v53 = vmax.f32 %v869_v46, %v870_v49 }
 0x1d5   :  { %v854_v54 = vrot.slane %v853_v50, 1  ;;  %v859_v55 = vmax.f32 %v857_v47, %v858_v51 }
 0x1d6   :  { %v867_v56 = vmax.f32 %v865_v48, %v866_v52  ;;  %v872_v57 = vrot.slane %v871_v53, 1 }
 0x1d7   :  { %v855_v58 = vmax.f32 %v853_v50, %v854_v54  ;;  %v860_v29 = vrot.slane %v859_v55, 1 }
 0x1d8   :  { %v873_v59 = vmax.f32 %v871_v53, %v872_v57  ;;  %v887_v62 = vmul.f32 %v1551_v63, %v867_v56 }
 0x1d9   :  { %v861_v60 = vmax.f32 %v859_v55, %v860_v29  ;;  %v885_v61 = vmul.f32 %v1551_v63, %v855_v58 }
 0x1da   :  { %v888_v1 = vmul.f32 %v1551_v63, %v873_v59  ;;  %v912_v5 = vrot.slane %v887_v62, 2 }
 0x1db   :  { %v886_v0 = vmul.f32 %v1551_v63, %v861_v60  ;;  %v906_v2 = vrot.slane %v885_v61, 4 }
 0x1dc   :  { %v915_v7 = vrot.slane %v888_v1, 1 }
 0x1dd   :  { %v908_v3 = vsel %vm907_vm3, %v906_v2, %v905_v32  ;;  %v909_v4 = vrot.slane %v886_v0, 3 }
 0x1df   :  { %v911_v6 = vsel %vm910_vm4, %v909_v4, %v908_v3 }
 0x1e0   :  { %v914_v8 = vsel %vm913_vm5, %v912_v5, %v911_v6 }
 0x1e1   :  { %v917_v9 = vsel %vm916_vm6, %v915_v7, %v914_v8 }
 0x1e2   :  { %919 = vadd.xlane.f32.xlu1 %v917_v9 }
 0x26f   :  { %v920_v11 = vpop.xlane.xlu1 %919 }
 0x270   :  { %v928_v12 = vadd.f32 %v1054_v10, %v920_v11 }
 0x272   :  { %v1055_v13 = vmul.f32 -1.442695, %v928_v12 }
 0x274   :  { %1286 = vpow2.f32 %v1055_v13 }
 0x27e   :  { %v1287_v14 = vpop.eup %1286 }
 0x27f   :  { %v932_v15 = vadd.f32 1.0, %v1287_v14 }
 0x281   :  { %1288 = vrcp.f32 %v932_v15 }
 0x28b   :  { %v1289_v63 = vpop.eup %1288 }
 0x28c   :  { %937 = vperm.xlu0 %1253, %v1289_v63  }
 0x30b   :  { %v938_v16 = vpop.permute.xlu0 %937 }
 0x30c   :  { %940 = vst [vmem:[#allocation6] sm:$0xff] %v938_v16 }
 0x30d   :  { %1323 = shalt.err (!%p1320_p12)
}
 0x30e   :  { %s1324_s9 = scalar_lea.hbm %s1587_s6, 128 }
 0x30f   :  { %p1325_p13 = scmp.ne.s32.totalorder %s1587_s6, %s1324_s9  ;;  %p1328_p0 = scmp.lt.u32.totalorder %s1324_s9, %s1587_s6 }
 0x311   :  { %p1330_p1 = pnand %p1328_p0, %p1325_p13 }
 0x313   :  { %1333 = shalt.err (!%p1330_p1)
}
 0x314   :  { %950 = dma.vmem_to_hbm [thread:$0]  %s948_s30, 128, %s1587_s6, [#allocation5]  }
 0x315   :  { %1336 = dma.done.wait [#allocation5], 128  }
 0x316   :  { %1337 = vsyncadd [#allocation5], 4294967168 }
 0x317   :  { %954 = vsyncpa [#allocation4], 1 }
 0x318   :  { %955 = vsyncpa [#allocation5], 1 }

</bundles_post_ra>
